<compile_context>
chip_gen: v5e
topology: v5e:2x2
jax: 0.10.0
libtpu: 0.0.40
codegen_flags: <defaults>
</compile_context>

<pallas_src>
import jax
import jax.numpy as jnp
from jax.experimental import pallas as pl
from jax.experimental.pallas import tpu as pltpu


FUSED = 128         # fused lane width for both hidden layers (tower1 | tower2)
OUTW = 8            # output lane width: q1 in lane 0, q2 in lane 1, rest zero
MAX_TILE_B = 2048   # max batch rows per grid step


def critic_kernel(s_ref, a_ref, was_ref, waa_ref, ba_ref,
                  wb_ref, bb_ref, wc_ref, bc_ref, out_ref):
    # s_ref:(TB,Ds) bf16, a_ref:(TB,Da) bf16; weights bf16; biases f32.
    h = (jnp.dot(s_ref[...], was_ref[...], preferred_element_type=jnp.float32)
         + jnp.dot(a_ref[...], waa_ref[...], preferred_element_type=jnp.float32)
         + ba_ref[...])
    h = jnp.maximum(h, 0.0)                                   # ReLU in f32 (VPU)
    h = jnp.dot(h.astype(jnp.bfloat16), wb_ref[...],
                preferred_element_type=jnp.float32) + bb_ref[...]
    h = jnp.maximum(h, 0.0)
    q = jnp.dot(h.astype(jnp.bfloat16), wc_ref[...],
                preferred_element_type=jnp.float32) + bc_ref[...]
    out_ref[...] = q.astype(out_ref.dtype)                    # (TB, OUTW)


def pack_params(params, state_dim, action_dim, hidden_sizes):
    """Fuse twin towers into lane-packed bf16 weights + separate f32 biases."""
    h1, h2 = hidden_sizes
    assert 2 * h1 <= FUSED and 2 * h2 <= FUSED, "hidden sizes too large for FUSED=128"
    d = state_dim + action_dim

    wa = jnp.zeros((d, FUSED), jnp.float32)
    wa = wa.at[:, :h1].set(params["w1a"])
    wa = wa.at[:, h1:2 * h1].set(params["w2a"])
    was, waa = wa[:state_dim], wa[state_dim:]
    ba = jnp.zeros((1, FUSED), jnp.float32)
    ba = ba.at[0, :h1].set(params["b1a"][0])
    ba = ba.at[0, h1:2 * h1].set(params["b2a"][0])

    wb = jnp.zeros((FUSED, FUSED), jnp.float32)
    wb = wb.at[:h1, :h2].set(params["w1b"])
    wb = wb.at[h1:2 * h1, h2:2 * h2].set(params["w2b"])
    bb = jnp.zeros((1, FUSED), jnp.float32)
    bb = bb.at[0, :h2].set(params["b1b"][0])
    bb = bb.at[0, h2:2 * h2].set(params["b2b"][0])

    wc = jnp.zeros((FUSED, OUTW), jnp.float32)
    wc = wc.at[:h2, 0].set(params["w1c"][:, 0])
    wc = wc.at[h2:2 * h2, 1].set(params["w2c"][:, 0])
    bc = jnp.zeros((1, OUTW), jnp.float32)
    bc = bc.at[0, 0].set(params["b1c"][0, 0])
    bc = bc.at[0, 1].set(params["b2c"][0, 0])

    return (was.astype(jnp.bfloat16), waa.astype(jnp.bfloat16), ba,
            wb.astype(jnp.bfloat16), bb,
            wc.astype(jnp.bfloat16), bc)


def _cdiv(a, b):
    return -(-a // b)


def _round_up(n, m):
    return _cdiv(n, m) * m


def _choose_tiling(B):
    # >=2 grid steps once there is real work, so v7x's 2 TensorCores both run;
    # pick tile_b to minimize padding waste, rows multiple of 16 (bf16 packing).
    if B >= 32:
        nb = max(_cdiv(B, MAX_TILE_B), 2)
        tile_b = _round_up(_cdiv(B, nb), 16)
    else:
        nb = 1
        tile_b = _round_up(B, 8)
    return tile_b, tile_b * nb, nb


@jax.jit
def critic_forward(s, a, was, waa, ba, wb, bb, wc, bc):
    B, ds = s.shape
    da = a.shape[1]
    tile_b, b_pad, nb = _choose_tiling(B)

    # bf16 at the HBM boundary (fuses with upstream producers in a real step).
    s_bf = s.astype(jnp.bfloat16)
    a_bf = a.astype(jnp.bfloat16)
    if b_pad != B:
        s_bf = jnp.pad(s_bf, ((0, b_pad - B), (0, 0)))
        a_bf = jnp.pad(a_bf, ((0, b_pad - B), (0, 0)))

    flops = 2 * b_pad * (ds * FUSED + da * FUSED + FUSED * FUSED + FUSED * OUTW)
    bytes_accessed = (b_pad * (ds + da) * 2
                      + (was.size + waa.size + wb.size + wc.size) * 2
                      + (ba.size + bb.size + bc.size) * 4
                      + b_pad * OUTW * 4)

    out = pl.pallas_call(
        critic_kernel,
        out_shape=jax.ShapeDtypeStruct((b_pad, OUTW), jnp.float32),
        grid=(nb,),
        in_specs=[
            pl.BlockSpec((tile_b, ds), lambda i: (i, 0)),    # state tile (bf16)
            pl.BlockSpec((tile_b, da), lambda i: (i, 0)),    # action tile (bf16)
            pl.BlockSpec((ds, FUSED), lambda i: (0, 0)),     # W_a state part
            pl.BlockSpec((da, FUSED), lambda i: (0, 0)),     # W_a action part
            pl.BlockSpec((1, FUSED), lambda i: (0, 0)),      # b_a (f32)
            pl.BlockSpec((FUSED, FUSED), lambda i: (0, 0)),  # W_b (block-diag)
            pl.BlockSpec((1, FUSED), lambda i: (0, 0)),      # b_b (f32)
            pl.BlockSpec((FUSED, OUTW), lambda i: (0, 0)),   # W_c (q1/q2 lanes)
            pl.BlockSpec((1, OUTW), lambda i: (0, 0)),       # b_c (f32)
        ],
        out_specs=pl.BlockSpec((tile_b, OUTW), lambda i: (i, 0)),
        compiler_params=pltpu.CompilerParams(
            dimension_semantics=("parallel",)),
        cost_estimate=pl.CostEstimate(flops=flops, transcendentals=0,
                                      bytes_accessed=bytes_accessed),
    )(s_bf, a_bf, was, waa, ba, wb, bb, wc, bc)

    q1 = out[:B, 0:1]
    q2 = out[:B, 1:2]
    return q1, q2


def init_params(key, input_size, hidden_sizes):
    """Deterministic synthetic init (PyTorch-Linear-style uniform bounds).
    Weights stored transposed vs. PyTorch: (in, out); biases (1, out)."""
    dims = [input_size] + list(hidden_sizes) + [1]
    names = ["a", "b", "c"]
    assert len(dims) - 1 == len(names)
    params = {}
    for tower in ("1", "2"):
        for li, (din, dout) in enumerate(zip(dims[:-1], dims[1:])):
            key, kw, kb = jax.random.split(key, 3)
            bound = 1.0 / jnp.sqrt(din)
            params[f"w{tower}{names[li]}"] = jax.random.uniform(
                kw, (din, dout), jnp.float32, -bound, bound)
            params[f"b{tower}{names[li]}"] = jax.random.uniform(
                kb, (1, dout), jnp.float32, -bound, bound)
    return params


if __name__ == "__main__":
    # Small shapes consistent with the module: state_dim + action_dim = input_size.
    B, STATE_DIM, ACTION_DIM = 8, 24, 8
    INPUT_SIZE = STATE_DIM + ACTION_DIM          # 32
    HIDDEN_SIZES = [32, 32]

    key = jax.random.PRNGKey(0)
    kp, ks, ka = jax.random.split(key, 3)
    params = init_params(kp, INPUT_SIZE, HIDDEN_SIZES)
    s = jax.random.normal(ks, (B, STATE_DIM), jnp.float32)
    a = jax.random.normal(ka, (B, ACTION_DIM), jnp.float32)

    packed = pack_params(params, STATE_DIM, ACTION_DIM, HIDDEN_SIZES)
    q1, q2 = critic_forward(s, a, *packed)
    jax.block_until_ready((q1, q2))

    # Pure-f32 reference with the original PyTorch semantics. Kernel matmuls
    # are bf16-in / f32-accumulate with f32 bias adds -> bf16 tolerance.
    x = jnp.concatenate([s, a], axis=-1)

    def mlp(x, t):
        h = jnp.maximum(x @ params[f"w{t}a"] + params[f"b{t}a"], 0.0)
        h = jnp.maximum(h @ params[f"w{t}b"] + params[f"b{t}b"], 0.0)
        return h @ params[f"w{t}c"] + params[f"b{t}c"]

    assert q1.shape == (B, 1) and q2.shape == (B, 1)
    assert jnp.allclose(q1, mlp(x, "1"), atol=5e-2, rtol=5e-2)
    assert jnp.allclose(q2, mlp(x, "2"), atol=5e-2, rtol=5e-2)

    # Also exercise the multi-step grid / padded-batch path (nb >= 2).
    B2 = 200
    ks2, ka2 = jax.random.split(jax.random.PRNGKey(1))
    s2 = jax.random.normal(ks2, (B2, STATE_DIM), jnp.float32)
    a2 = jax.random.normal(ka2, (B2, ACTION_DIM), jnp.float32)
    q1b, q2b = critic_forward(s2, a2, *packed)
    jax.block_until_ready((q1b, q2b))
    x2 = jnp.concatenate([s2, a2], axis=-1)
    assert q1b.shape == (B2, 1) and q2b.shape == (B2, 1)
    assert jnp.allclose(q1b, mlp(x2, "1"), atol=5e-2, rtol=5e-2)
    assert jnp.allclose(q2b, mlp(x2, "2"), atol=5e-2, rtol=5e-2)

    print("KERNEL_OK")
</pallas_src>

<mosaic_0001>
module attributes {stable_mosaic.version = 11 : i64} {
  func.func @critic_kernel(%arg0: i32, %arg1: memref<8x24xbf16, #tpu.memory_space<vmem>>, %arg2: memref<8x8xbf16, #tpu.memory_space<vmem>>, %arg3: memref<24x128xbf16, #tpu.memory_space<vmem>>, %arg4: memref<8x128xbf16, #tpu.memory_space<vmem>>, %arg5: memref<1x128xf32, #tpu.memory_space<vmem>>, %arg6: memref<128x128xbf16, #tpu.memory_space<vmem>>, %arg7: memref<1x128xf32, #tpu.memory_space<vmem>>, %arg8: memref<128x8xbf16, #tpu.memory_space<vmem>>, %arg9: memref<1x8xf32, #tpu.memory_space<vmem>>, %arg10: memref<8x8xf32, #tpu.memory_space<vmem>>) attributes {dimension_semantics = [#tpu.dimension_semantics<parallel>], iteration_bounds = array<i64: 1>, scalar_prefetch = 0 : i64, scratch_operands = 0 : i64, tpu.core_type = #tpu.core_type<tc>, window_params = [{transform_indices = @transform_0, window_bounds = array<i64: 8, 24>}, {transform_indices = @transform_1, window_bounds = array<i64: 8, 8>}, {pipeline_mode = #tpu.pipeline_mode<synchronous>, transform_indices = @transform_2, window_bounds = array<i64: 24, 128>}, {pipeline_mode = #tpu.pipeline_mode<synchronous>, transform_indices = @transform_3, window_bounds = array<i64: 8, 128>}, {pipeline_mode = #tpu.pipeline_mode<synchronous>, transform_indices = @transform_4, window_bounds = array<i64: 1, 128>}, {pipeline_mode = #tpu.pipeline_mode<synchronous>, transform_indices = @transform_5, window_bounds = array<i64: 128, 128>}, {pipeline_mode = #tpu.pipeline_mode<synchronous>, transform_indices = @transform_6, window_bounds = array<i64: 1, 128>}, {pipeline_mode = #tpu.pipeline_mode<synchronous>, transform_indices = @transform_7, window_bounds = array<i64: 128, 8>}, {pipeline_mode = #tpu.pipeline_mode<synchronous>, transform_indices = @transform_8, window_bounds = array<i64: 1, 8>}, {transform_indices = @transform_9, window_bounds = array<i64: 8, 8>}]} {
    %c0 = arith.constant 0 : index
    %c0_0 = arith.constant 0 : index
    %0 = vector.load %arg1[%c0, %c0_0] : memref<8x24xbf16, #tpu.memory_space<vmem>>, vector<8x24xbf16>
    %c0_1 = arith.constant 0 : index
    %c0_2 = arith.constant 0 : index
    %1 = vector.load %arg3[%c0_1, %c0_2] : memref<24x128xbf16, #tpu.memory_space<vmem>>, vector<24x128xbf16>
    %cst = arith.constant dense<0.000000e+00> : vector<8x128xf32>
    %2 = tpu.matmul %0, %1, %cst {dimension_numbers = #tpu.dot_dimension_numbers<[1], [0], [0], [1], [0, 0, 1, 1], [], []>} : vector<8x24xbf16>, vector<24x128xbf16>, vector<8x128xf32> -> vector<8x128xf32>
    %c0_3 = arith.constant 0 : index
    %c0_4 = arith.constant 0 : index
    %3 = vector.load %arg2[%c0_3, %c0_4] : memref<8x8xbf16, #tpu.memory_space<vmem>>, vector<8x8xbf16>
    %c0_5 = arith.constant 0 : index
    %c0_6 = arith.constant 0 : index
    %4 = vector.load %arg4[%c0_5, %c0_6] : memref<8x128xbf16, #tpu.memory_space<vmem>>, vector<8x128xbf16>
    %cst_7 = arith.constant dense<0.000000e+00> : vector<8x128xf32>
    %5 = tpu.matmul %3, %4, %cst_7 {dimension_numbers = #tpu.dot_dimension_numbers<[1], [0], [0], [1], [0, 0, 1, 1], [], []>} : vector<8x8xbf16>, vector<8x128xbf16>, vector<8x128xf32> -> vector<8x128xf32>
    %6 = arith.addf %2, %5 : vector<8x128xf32>
    %c0_8 = arith.constant 0 : index
    %c0_9 = arith.constant 0 : index
    %7 = vector.load %arg5[%c0_8, %c0_9] : memref<1x128xf32, #tpu.memory_space<vmem>>, vector<1x128xf32>
    %8 = vector.broadcast %7 : vector<1x128xf32> to vector<8x128xf32>
    %9 = arith.addf %6, %8 : vector<8x128xf32>
    %cst_10 = arith.constant 0.000000e+00 : f32
    %10 = vector.broadcast %cst_10 : f32 to vector<8x128xf32>
    %11 = arith.maximumf %9, %10 : vector<8x128xf32>
    %12 = arith.truncf %11 : vector<8x128xf32> to vector<8x128xbf16>
    %c0_11 = arith.constant 0 : index
    %c0_12 = arith.constant 0 : index
    %13 = vector.load %arg6[%c0_11, %c0_12] : memref<128x128xbf16, #tpu.memory_space<vmem>>, vector<128x128xbf16>
    %cst_13 = arith.constant dense<0.000000e+00> : vector<8x128xf32>
    %14 = tpu.matmul %12, %13, %cst_13 {dimension_numbers = #tpu.dot_dimension_numbers<[1], [0], [0], [1], [0, 0, 1, 1], [], []>} : vector<8x128xbf16>, vector<128x128xbf16>, vector<8x128xf32> -> vector<8x128xf32>
    %c0_14 = arith.constant 0 : index
    %c0_15 = arith.constant 0 : index
    %15 = vector.load %arg7[%c0_14, %c0_15] : memref<1x128xf32, #tpu.memory_space<vmem>>, vector<1x128xf32>
    %16 = vector.broadcast %15 : vector<1x128xf32> to vector<8x128xf32>
    %17 = arith.addf %14, %16 : vector<8x128xf32>
    %cst_16 = arith.constant 0.000000e+00 : f32
    %18 = vector.broadcast %cst_16 : f32 to vector<8x128xf32>
    %19 = arith.maximumf %17, %18 : vector<8x128xf32>
    %20 = arith.truncf %19 : vector<8x128xf32> to vector<8x128xbf16>
    %c0_17 = arith.constant 0 : index
    %c0_18 = arith.constant 0 : index
    %21 = vector.load %arg8[%c0_17, %c0_18] : memref<128x8xbf16, #tpu.memory_space<vmem>>, vector<128x8xbf16>
    %cst_19 = arith.constant dense<0.000000e+00> : vector<8x8xf32>
    %22 = tpu.matmul %20, %21, %cst_19 {dimension_numbers = #tpu.dot_dimension_numbers<[1], [0], [0], [1], [0, 0, 1, 1], [], []>} : vector<8x128xbf16>, vector<128x8xbf16>, vector<8x8xf32> -> vector<8x8xf32>
    %c0_20 = arith.constant 0 : index
    %c0_21 = arith.constant 0 : index
    %23 = vector.load %arg9[%c0_20, %c0_21] : memref<1x8xf32, #tpu.memory_space<vmem>>, vector<1x8xf32>
    %24 = vector.broadcast %23 : vector<1x8xf32> to vector<8x8xf32>
    %25 = arith.addf %22, %24 : vector<8x8xf32>
    %c0_22 = arith.constant 0 : index
    %c0_23 = arith.constant 0 : index
    %26 = vector.load %arg10[%c0_22, %c0_23] : memref<8x8xf32, #tpu.memory_space<vmem>>, vector<8x8xf32>
    tpu.vector_store %arg10[%c0_22, %c0_23], %25 {strides = array<i32>} : memref<8x8xf32, #tpu.memory_space<vmem>>, vector<8x8xf32>,
    return
  }
  func.func @transform_0(%arg0: i32) -> (i32, i32) {
    %c0_i32 = arith.constant 0 : i32
    %c0_i32_0 = arith.constant 0 : i32
    return %arg0, %c0_i32 : i32, i32
  }
  func.func @transform_1(%arg0: i32) -> (i32, i32) {
    %c0_i32 = arith.constant 0 : i32
    %c0_i32_0 = arith.constant 0 : i32
    return %arg0, %c0_i32 : i32, i32
  }
  func.func @transform_2(%arg0: i32) -> (i32, i32) {
    %c0_i32 = arith.constant 0 : i32
    %c0_i32_0 = arith.constant 0 : i32
    %c0_i32_1 = arith.constant 0 : i32
    return %c0_i32, %c0_i32_0 : i32, i32
  }
  func.func @transform_3(%arg0: i32) -> (i32, i32) {
    %c0_i32 = arith.constant 0 : i32
    %c0_i32_0 = arith.constant 0 : i32
    %c0_i32_1 = arith.constant 0 : i32
    return %c0_i32, %c0_i32_0 : i32, i32
  }
  func.func @transform_4(%arg0: i32) -> (i32, i32) {
    %c0_i32 = arith.constant 0 : i32
    %c0_i32_0 = arith.constant 0 : i32
    %c0_i32_1 = arith.constant 0 : i32
    return %c0_i32, %c0_i32_0 : i32, i32
  }
  func.func @transform_5(%arg0: i32) -> (i32, i32) {
    %c0_i32 = arith.constant 0 : i32
    %c0_i32_0 = arith.constant 0 : i32
    %c0_i32_1 = arith.constant 0 : i32
    return %c0_i32, %c0_i32_0 : i32, i32
  }
  func.func @transform_6(%arg0: i32) -> (i32, i32) {
    %c0_i32 = arith.constant 0 : i32
    %c0_i32_0 = arith.constant 0 : i32
    %c0_i32_1 = arith.constant 0 : i32
    return %c0_i32, %c0_i32_0 : i32, i32
  }
  func.func @transform_7(%arg0: i32) -> (i32, i32) {
    %c0_i32 = arith.constant 0 : i32
    %c0_i32_0 = arith.constant 0 : i32
    %c0_i32_1 = arith.constant 0 : i32
    return %c0_i32, %c0_i32_0 : i32, i32
  }
  func.func @transform_8(%arg0: i32) -> (i32, i32) {
    %c0_i32 = arith.constant 0 : i32
    %c0_i32_0 = arith.constant 0 : i32
    %c0_i32_1 = arith.constant 0 : i32
    return %c0_i32, %c0_i32_0 : i32, i32
  }
  func.func @transform_9(%arg0: i32) -> (i32, i32) {
    %c0_i32 = arith.constant 0 : i32
    %c0_i32_0 = arith.constant 0 : i32
    return %arg0, %c0_i32 : i32, i32
  }
}

</mosaic_0001>

<bundles_post_ra>
// kernel: critic_forward.1
= control target key start
LH: loop header
LB: loop body
LE: loop exit
PB: predicated region body
PF: predicated region fallthrough
CT: control target
= control target key end

     0   :  { %vm43_vm0 = vcmask 1043456   ;;  %vm39_vm1 = vcmask 64512   ;;  %vm69_vm2 = vcmask 195584   ;;  %s484_s3 = inlined_call_operand.vmem [shape: bf16[8,128], index: 3, kind: input, shape index: {}]   ;;  %s485_s1 = inlined_call_operand.vmem [shape: bf16[8,8], index: 1, kind: input, shape index: {}]   ;;  %s486_s2 = inlined_call_operand.vmem [shape: bf16[24,128], index: 2, kind: input, shape index: {}]   ;;  %s487_s5 = inlined_call_operand.vmem [shape: bf16[128,128], index: 5, kind: input, shape index: {}]   ;;  %s488_s0 = inlined_call_operand.vmem [shape: bf16[8,24], index: 0, kind: input, shape index: {}]   ;;  %s489_s4 = inlined_call_operand.vmem [shape: f32[1,128], index: 4, kind: input, shape index: {}]   ;;  %s490_s6 = inlined_call_operand.vmem [shape: f32[1,128], index: 6, kind: input, shape index: {}]   ;;  %s491_s7 = inlined_call_operand.vmem [shape: bf16[128,8], index: 7, kind: input, shape index: {}]   ;;  %s492_s8 = inlined_call_operand.vmem [shape: f32[1,8], index: 8, kind: input, shape index: {}]   ;;  %s493_s9 = inlined_call_operand.vmem [shape: f32[8,8], index: 9, kind: output, shape index: {}]  }
   0x1   :  { %v38_v0 = vld [vmem:[%s484_s3] sm:$0xf]  ;;  %v36_v1 = vld [vmem:[%s486_s2 + $0x8] sm:$0xf]  ;;  %v343_v4 = vld [vmem:[%s487_s5 + $0x38] sm:$0xff] }
   0x2   :  { %v45_v2 = vsel %vm43_vm0, %v38_v0, 0  ;;  %v65_v3 = vunpack.c.l.b16 %v36_v1  ;;  %v37_v5 = vld [vmem:[%s485_s1] sm:$0xf]  ;;  %164 = vmatpush.bf16.msra.mxu2 %v343_v4  ;;  %v342_v7 = vld [vmem:[%s487_s5 + $0x30] sm:$0xff]  ;;  %v341_v10 = vld [vmem:[%s487_s5 + $0x28] sm:$0xff] }
   0x3   :  { %54 = vmatpush.bf16.msra.mxu0 %v45_v2  ;;  %v335_v9 = vld [vmem:[%s486_s2] sm:$0xff]  ;;  %v339_v13 = vld [vmem:[%s487_s5 + $0x18] sm:$0xff]  ;;  %v338_v14 = vld [vmem:[%s487_s5 + $0x10] sm:$0xff] }
   0x4   :  { %v67_v6 = vpack.c.b16 %v65_v3, %v65_v3  ;;  %v33_v11 = vld [vmem:[%s488_s0] sm:$0xf]  ;;  %v337_v15 = vld [vmem:[%s487_s5 + $0x8] sm:$0xff]  ;;  %v351_v17 = vld [vmem:[%s491_s7 + $0x38] sm:$0xff] }
   0x5   :  { %v340_v12 = vld [vmem:[%s487_s5 + $0x20] sm:$0xff]  ;;  %247 = vmatpush.bf16.msra.mxu3 %v351_v17  ;;  %v350_v18 = vld [vmem:[%s491_s7 + $0x30] sm:$0xff]  ;;  %v349_v19 = vld [vmem:[%s491_s7 + $0x28] sm:$0xff] }
   0x6   :  { %265 = vmatmul.msk.bf16.vlgmr.msra.gmra.mxu0 %vm39_vm1, %v37_v5  ;;  %v74_v8 = vsel %vm43_vm0, %v67_v6, 0  ;;  %165 = vmatpush.bf16.msra.mxu2 %v342_v7  ;;  %v336_v16 = vld [vmem:[%s487_s5] sm:$0xff]  ;;  %v347_v21 = vld [vmem:[%s491_s7 + $0x18] sm:$0xff]  ;;  %v346_v23 = vld [vmem:[%s491_s7 + $0x10] sm:$0xff] }
   0x7   :  { %82 = vmatpush.bf16.msra.mxu1 %v74_v8  ;;  %v348_v20 = vld [vmem:[%s491_s7 + $0x20] sm:$0xff]  ;;  %v345_v32 = vld [vmem:[%s491_s7 + $0x8] sm:$0xff] }
   0x8   :  { %v352_v24 = vld [vmem:[%s489_s4] ss:$0 sm:$0xff] }
   0x9   :  { %248 = vmatpush.bf16.msra.mxu3 %v350_v18  ;;  %v344_v33 = vld [vmem:[%s491_s7] sm:$0xff] }
   0xa   :  { %166 = vmatpush.bf16.msra.mxu2 %v341_v10  ;;  %v353_v34 = vld [vmem:[%s490_s6] ss:$0 sm:$0xff] }
   0xb   :  { %83 = vmatpush.bf16.msra.mxu1 %v335_v9  ;;  %v354_v40 = vld [vmem:[%s492_s8] ss:$0 sm:$0xff] }
   0xd   :  { %249 = vmatpush.bf16.msra.mxu3 %v349_v19 }
   0xe   :  { %270 = vmatmul.msk.bf16.vlgmr.msra.gmra.mxu1 %vm69_vm2, %v33_v11  ;;  %167 = vmatpush.bf16.msra.mxu2 %v340_v12 }
  0x11   :  { %250 = vmatpush.bf16.msra.mxu3 %v348_v20 }
  0x12   :  { %168 = vmatpush.bf16.msra.mxu2 %v339_v13 }
  0x15   :  { %251 = vmatpush.bf16.msra.mxu3 %v347_v21 }
  0x16   :  { %169 = vmatpush.bf16.msra.mxu2 %v338_v14 }
  0x19   :  { %252 = vmatpush.bf16.msra.mxu3 %v346_v23 }
  0x1a   :  { %170 = vmatpush.bf16.msra.mxu2 %v337_v15 }
  0x1d   :  { %253 = vmatpush.bf16.msra.mxu3 %v345_v32 }
  0x1e   :  { %171 = vmatpush.bf16.msra.mxu2 %v336_v16 }
  0x21   :  { %254 = vmatpush.bf16.msra.mxu3 %v344_v33 }
  0x83   :  { %v56_v22 = vpop.f32.mrf.mxu0 }
  0x8b   :  { %v58_v25 = vpop.f32.mrf.mxu0  ;;  %v85_v26 = vpop.f32.mrf.mxu1 }
  0x8c   :  { %v86_v27 = vadd.f32 %v85_v26, %v56_v22 }
  0x8e   :  { %v93_v28 = vadd.f32 %v352_v24, %v86_v27 }
  0x90   :  { %v94_v29 = vmax.f32 %v93_v28, 0.0 }
  0x92   :  { %v95_v30 = vpack.c.bf16 %v94_v29, %v94_v29 }
  0x93   :  { %v87_v31 = vpop.f32.mrf.mxu1 }
  0x94   :  { %172 = vmatmul.bf16.vlgmr.msra.gmra.mxu2 %v95_v30 }
 0x117   :  { %v173_v35 = vpop.f32.mrf.mxu2 }
 0x118   :  { %v174_v36 = vadd.f32 %v353_v34, %v173_v35 }
 0x11a   :  { %v177_v37 = vmax.f32 %v174_v36, 0.0 }
 0x11c   :  { %v178_v38 = vpack.c.bf16 %v177_v37, %v177_v37 }
 0x11e   :  { %255 = vmatmul.bf16.vlgmr.msra.gmra.mxu3 %v178_v38 }
 0x11f   :  { %v175_v39 = vpop.f32.mrf.mxu2 }
 0x1a1   :  { %v256_v41 = vpop.f32.mrf.mxu3 }
 0x1a2   :  { %v257_v42 = vadd.f32 %v354_v40, %v256_v41 }
 0x1a4   :  { %260 = vst.msk [vmem:[%s493_s9] sm:$0xff] %vm39_vm1, %v257_v42 }
 0x1a9   :  { %v258_v43 = vpop.f32.mrf.mxu3 }

</bundles_post_ra>
